<compile_context>
chip_gen: v6e
topology: v6e:2x2x1
jax: 0.10.0
libtpu: 0.0.40
codegen_flags: <defaults>
</compile_context>

<pallas_src>
import functools

import jax
import jax.numpy as jnp
from jax.experimental import pallas as pl
from jax.experimental.pallas import tpu as pltpu

_GROUP = 8  # f32 sublane count: rows gathered + stored per coalesced group


def _reg_loss_kernel(ind_ref, feat_ref, tgt_ref, mask_ref,
                     sum_ref, msum_ref, pred_ref, *, n_groups):
    # ind_ref : SMEM (B*M,) int32   (scalar prefetch, flattened -> no 2-D SMEM padding)
    # feat_ref: VMEM (HW, C)        this batch's channels-last feature plane
    # tgt_ref : VMEM (M, C)
    # mask_ref: VMEM (M, 1) f32     0/1 keypoint mask
    # sum_ref : VMEM (1, C)         per-batch partial sum of |pred - tgt| * mask
    # msum_ref: VMEM (1, 1)         per-batch mask sum (fused epilogue input)
    # pred_ref: VMEM (M, C)         gather scratch in the *input* dtype
    b = pl.program_id(0)
    HW = feat_ref.shape[0]
    M = tgt_ref.shape[0]

    def gather_group(base):
        # base is a multiple of _GROUP (static int, or traced with multiple_of hint).
        rows = []
        for r in range(_GROUP):
            idx = ind_ref[b * M + base + r]
            # Clamp: padded / garbage keypoint slots must not read OOB VMEM.
            idx = jnp.clip(idx, 0, HW - 1)
            rows.append(feat_ref[pl.ds(idx, 1), :])
        # One aligned (GROUP, C) store instead of GROUP masked 1-sublane stores.
        pred_ref[pl.ds(base, _GROUP), :] = jnp.concatenate(rows, axis=0)

    if n_groups <= 16:
        # Full static unroll: lets the scheduler co-issue vld / vst / scalar
        # slots across the whole gather and removes per-iteration branch cost.
        for g in range(n_groups):
            gather_group(g * _GROUP)
    else:
        @pl.loop(0, n_groups)
        def _(g):
            gather_group(pl.multiple_of(g * _GROUP, _GROUP))

    # Single bulk cast (the gather loop above is pure load/store work).
    pred = pred_ref[...].astype(jnp.float32)               # (M, C)
    tgt = tgt_ref[...].astype(jnp.float32)                 # (M, C)
    mk = mask_ref[...]                                     # (M, 1)
    # mask is a non-negative 0/1 indicator, so |p*mk - t*mk| == |p - t| * mk.
    l1 = jnp.abs(pred - tgt) * mk                          # (M, C)
    sum_ref[...] = jnp.sum(l1, axis=0, keepdims=True)      # (1, C)
    msum_ref[...] = jnp.sum(mk, axis=0, keepdims=True)     # (1, 1)


def _round_up(x, m):
    return (x + m - 1) // m * m


def _padded_vmem_bytes(shape, dtype):
    """Lane/sublane-padded VMEM footprint of one buffer of this shape."""
    itemsize = jnp.dtype(dtype).itemsize
    sub = shape[-2] if len(shape) >= 2 else 1
    lane = shape[-1]
    lead = 1
    for s in shape[:-2]:
        lead *= int(s)
    sub_tile = max(8, 32 // itemsize)  # f32: 8, bf16: 16, int8: 32 sublanes
    return lead * _round_up(sub, sub_tile) * _round_up(lane, 128) * itemsize


def reg_loss(output, mask, ind, target):
    """output: [B, C, H, W]; mask, ind: [B, M]; target: [B, M, C] -> [C]."""
    B, C, H, W = output.shape
    HW = H * W
    M = ind.shape[1]

    # Pad M to a multiple of the gather group; padded slots carry mask == 0 so
    # they contribute exactly zero to both sums.
    M_pad = _round_up(M, _GROUP)
    pad = M_pad - M

    # (B, C, H, W) -> (B, HW, C): the keypoint gather becomes a cheap dynamic
    # sublane-offset row load inside the kernel.
    # TODO(synk): for very large HW the ideal is a producer-side channels-last
    # layout (or an HBM-resident chunked DMA gather) so the feature plane is
    # neither transposed in HBM nor fully staged in lane-padded VMEM.
    feat = jnp.transpose(output.reshape(B, C, HW), (0, 2, 1))

    ind_i = ind.astype(jnp.int32)
    mask_f = mask.astype(jnp.float32)
    tgt = target
    if pad:
        ind_i = jnp.pad(ind_i, ((0, 0), (0, pad)))
        mask_f = jnp.pad(mask_f, ((0, 0), (0, pad)))
        tgt = jnp.pad(tgt, ((0, 0), (0, pad), (0, 0)))
    ind_flat = ind_i.reshape(B * M_pad)            # 1-D SMEM: no (8,128) padding
    mask3 = mask_f[..., None]                      # (B, M_pad, 1)

    n_groups = M_pad // _GROUP

    # VMEM budget: double-buffered inputs + outputs + scratch, with headroom.
    vmem_needed = (
        2 * (_padded_vmem_bytes((HW, C), feat.dtype)
             + _padded_vmem_bytes((M_pad, C), tgt.dtype)
             + _padded_vmem_bytes((M_pad, 1), jnp.float32))
        + 2 * (_padded_vmem_bytes((1, C), jnp.float32)
               + _padded_vmem_bytes((1, 1), jnp.float32))
        + _padded_vmem_bytes((M_pad, C), feat.dtype))
    vmem_limit = int(max(16 << 20, min(vmem_needed + (4 << 20), 96 << 20)))

    sums, msums = pl.pallas_call(
        functools.partial(_reg_loss_kernel, n_groups=n_groups),
        out_shape=(jax.ShapeDtypeStruct((B, 1, C), jnp.float32),
                   jax.ShapeDtypeStruct((B, 1, 1), jnp.float32)),
        grid_spec=pltpu.PrefetchScalarGridSpec(
            num_scalar_prefetch=1,
            grid=(B,),
            in_specs=[
                pl.BlockSpec((None, HW, C), lambda b, ind_r: (b, 0, 0)),
                pl.BlockSpec((None, M_pad, C), lambda b, ind_r: (b, 0, 0)),
                pl.BlockSpec((None, M_pad, 1), lambda b, ind_r: (b, 0, 0)),
            ],
            out_specs=[
                pl.BlockSpec((None, 1, C), lambda b, ind_r: (b, 0, 0)),
                pl.BlockSpec((None, 1, 1), lambda b, ind_r: (b, 0, 0)),
            ],
            scratch_shapes=[pltpu.VMEM((M_pad, C), feat.dtype)],
        ),
        compiler_params=pltpu.CompilerParams(
            dimension_semantics=("parallel",),
            vmem_limit_bytes=vmem_limit),
    )(ind_flat, feat, tgt, mask3)

    # Fused epilogue: one reduce over per-batch partials + one divide (the
    # per-batch mask sums were produced inside the kernel).
    num = jnp.sum(msums) + jnp.float32(1e-4)
    return jnp.sum(sums[:, 0, :], axis=0) / num
    # TODO(synk): semi=True (det_scores-weighted) branch not implemented; this
    # kernel reproduces the default semi=False forward path only.
    # TODO(synk): when B == 1 on v7x, split M across a second parallel grid
    # axis so both TensorCores are used.


def _reference_reg_loss(output, mask, ind, target):
    """Pure-JAX reference mirroring the PyTorch RegLoss (semi=False) semantics."""
    B, C, H, W = output.shape
    feat = jnp.transpose(output.reshape(B, C, H * W), (0, 2, 1))       # (B,HW,C)
    pred = jnp.take_along_axis(feat, ind[..., None].astype(jnp.int32), axis=1)
    mk = mask.astype(jnp.float32)[..., None]
    l1 = jnp.abs(pred * mk - target * mk) / (jnp.sum(mk) + 1e-4)
    return jnp.sum(l1, axis=(0, 1))                                    # (C,)


if __name__ == "__main__":
    key = jax.random.PRNGKey(0)
    B, C, H, W, M = 2, 4, 16, 16, 8

    k1, k2, k3, k4 = jax.random.split(key, 4)
    output = jax.random.normal(k1, (B, C, H, W), jnp.float32)
    target = jax.random.normal(k2, (B, M, C), jnp.float32)
    ind = jax.random.randint(k3, (B, M), 0, H * W, jnp.int32)
    mask = (jax.random.uniform(k4, (B, M)) > 0.3).astype(jnp.float32)

    loss = jax.block_until_ready(reg_loss(output, mask, ind, target))
    ref = jax.block_until_ready(_reference_reg_loss(output, mask, ind, target))

    assert loss.shape == (C,), loss.shape
    assert jnp.allclose(loss, ref, rtol=1e-5, atol=1e-5), (loss, ref)
    print("KERNEL_OK")
</pallas_src>

<mosaic_0001>
module attributes {stable_mosaic.version = 11 : i64} {
  func.func @_reg_loss_kernel(%arg0: i32, %arg1: memref<16xi32, #tpu.memory_space<smem>>, %arg2: memref<1x256x4xf32, #tpu.memory_space<vmem>>, %arg3: memref<1x8x4xf32, #tpu.memory_space<vmem>>, %arg4: memref<1x8x1xf32, #tpu.memory_space<vmem>>, %arg5: memref<1x1x4xf32, #tpu.memory_space<vmem>>, %arg6: memref<1x1x1xf32, #tpu.memory_space<vmem>>, %arg7: memref<8x4xf32, #tpu.memory_space<vmem>>) attributes {dimension_semantics = [#tpu.dimension_semantics<parallel>], iteration_bounds = array<i64: 2>, scalar_prefetch = 1 : i64, scratch_operands = 1 : i64, tpu.core_type = #tpu.core_type<tc>, window_params = [{transform_indices = @transform_0, window_bounds = array<i64: 1, 256, 4>}, {transform_indices = @transform_1, window_bounds = array<i64: 1, 8, 4>}, {transform_indices = @transform_2, window_bounds = array<i64: 1, 8, 1>}, {transform_indices = @transform_3, window_bounds = array<i64: 1, 1, 4>}, {transform_indices = @transform_4, window_bounds = array<i64: 1, 1, 1>}]} {
    %c8_i32 = arith.constant 8 : i32
    %0 = arith.muli %arg0, %c8_i32 : i32
    %c0_i32 = arith.constant 0 : i32
    %1 = arith.addi %0, %c0_i32 : i32
    %c0_i32_0 = arith.constant 0 : i32
    %2 = arith.addi %1, %c0_i32_0 : i32
    %3 = arith.index_cast %2 : i32 to index
    %4 = memref.load %arg1[%3] : memref<16xi32, #tpu.memory_space<smem>>
    %c0_i32_1 = arith.constant 0 : i32
    %c255_i32 = arith.constant 255 : i32
    %5 = arith.maxsi %c0_i32_1, %4 : i32
    %6 = arith.minsi %c255_i32, %5 : i32
    %c0 = arith.constant 0 : index
    %7 = arith.index_cast %6 : i32 to index
    %c0_2 = arith.constant 0 : index
    %8 = vector.load %arg2[%c0, %7, %c0_2] : memref<1x256x4xf32, #tpu.memory_space<vmem>>, vector<1x1x4xf32>
    %9 = vector.shape_cast %8 : vector<1x1x4xf32> to vector<1x4xf32>
    %c8_i32_3 = arith.constant 8 : i32
    %10 = arith.muli %arg0, %c8_i32_3 : i32
    %c0_i32_4 = arith.constant 0 : i32
    %11 = arith.addi %10, %c0_i32_4 : i32
    %c1_i32 = arith.constant 1 : i32
    %12 = arith.addi %11, %c1_i32 : i32
    %13 = arith.index_cast %12 : i32 to index
    %14 = memref.load %arg1[%13] : memref<16xi32, #tpu.memory_space<smem>>
    %c0_i32_5 = arith.constant 0 : i32
    %c255_i32_6 = arith.constant 255 : i32
    %15 = arith.maxsi %c0_i32_5, %14 : i32
    %16 = arith.minsi %c255_i32_6, %15 : i32
    %c0_7 = arith.constant 0 : index
    %17 = arith.index_cast %16 : i32 to index
    %c0_8 = arith.constant 0 : index
    %18 = vector.load %arg2[%c0_7, %17, %c0_8] : memref<1x256x4xf32, #tpu.memory_space<vmem>>, vector<1x1x4xf32>
    %19 = vector.shape_cast %18 : vector<1x1x4xf32> to vector<1x4xf32>
    %c8_i32_9 = arith.constant 8 : i32
    %20 = arith.muli %arg0, %c8_i32_9 : i32
    %c0_i32_10 = arith.constant 0 : i32
    %21 = arith.addi %20, %c0_i32_10 : i32
    %c2_i32 = arith.constant 2 : i32
    %22 = arith.addi %21, %c2_i32 : i32
    %23 = arith.index_cast %22 : i32 to index
    %24 = memref.load %arg1[%23] : memref<16xi32, #tpu.memory_space<smem>>
    %c0_i32_11 = arith.constant 0 : i32
    %c255_i32_12 = arith.constant 255 : i32
    %25 = arith.maxsi %c0_i32_11, %24 : i32
    %26 = arith.minsi %c255_i32_12, %25 : i32
    %c0_13 = arith.constant 0 : index
    %27 = arith.index_cast %26 : i32 to index
    %c0_14 = arith.constant 0 : index
    %28 = vector.load %arg2[%c0_13, %27, %c0_14] : memref<1x256x4xf32, #tpu.memory_space<vmem>>, vector<1x1x4xf32>
    %29 = vector.shape_cast %28 : vector<1x1x4xf32> to vector<1x4xf32>
    %c8_i32_15 = arith.constant 8 : i32
    %30 = arith.muli %arg0, %c8_i32_15 : i32
    %c0_i32_16 = arith.constant 0 : i32
    %31 = arith.addi %30, %c0_i32_16 : i32
    %c3_i32 = arith.constant 3 : i32
    %32 = arith.addi %31, %c3_i32 : i32
    %33 = arith.index_cast %32 : i32 to index
    %34 = memref.load %arg1[%33] : memref<16xi32, #tpu.memory_space<smem>>
    %c0_i32_17 = arith.constant 0 : i32
    %c255_i32_18 = arith.constant 255 : i32
    %35 = arith.maxsi %c0_i32_17, %34 : i32
    %36 = arith.minsi %c255_i32_18, %35 : i32
    %c0_19 = arith.constant 0 : index
    %37 = arith.index_cast %36 : i32 to index
    %c0_20 = arith.constant 0 : index
    %38 = vector.load %arg2[%c0_19, %37, %c0_20] : memref<1x256x4xf32, #tpu.memory_space<vmem>>, vector<1x1x4xf32>
    %39 = vector.shape_cast %38 : vector<1x1x4xf32> to vector<1x4xf32>
    %c8_i32_21 = arith.constant 8 : i32
    %40 = arith.muli %arg0, %c8_i32_21 : i32
    %c0_i32_22 = arith.constant 0 : i32
    %41 = arith.addi %40, %c0_i32_22 : i32
    %c4_i32 = arith.constant 4 : i32
    %42 = arith.addi %41, %c4_i32 : i32
    %43 = arith.index_cast %42 : i32 to index
    %44 = memref.load %arg1[%43] : memref<16xi32, #tpu.memory_space<smem>>
    %c0_i32_23 = arith.constant 0 : i32
    %c255_i32_24 = arith.constant 255 : i32
    %45 = arith.maxsi %c0_i32_23, %44 : i32
    %46 = arith.minsi %c255_i32_24, %45 : i32
    %c0_25 = arith.constant 0 : index
    %47 = arith.index_cast %46 : i32 to index
    %c0_26 = arith.constant 0 : index
    %48 = vector.load %arg2[%c0_25, %47, %c0_26] : memref<1x256x4xf32, #tpu.memory_space<vmem>>, vector<1x1x4xf32>
    %49 = vector.shape_cast %48 : vector<1x1x4xf32> to vector<1x4xf32>
    %c8_i32_27 = arith.constant 8 : i32
    %50 = arith.muli %arg0, %c8_i32_27 : i32
    %c0_i32_28 = arith.constant 0 : i32
    %51 = arith.addi %50, %c0_i32_28 : i32
    %c5_i32 = arith.constant 5 : i32
    %52 = arith.addi %51, %c5_i32 : i32
    %53 = arith.index_cast %52 : i32 to index
    %54 = memref.load %arg1[%53] : memref<16xi32, #tpu.memory_space<smem>>
    %c0_i32_29 = arith.constant 0 : i32
    %c255_i32_30 = arith.constant 255 : i32
    %55 = arith.maxsi %c0_i32_29, %54 : i32
    %56 = arith.minsi %c255_i32_30, %55 : i32
    %c0_31 = arith.constant 0 : index
    %57 = arith.index_cast %56 : i32 to index
    %c0_32 = arith.constant 0 : index
    %58 = vector.load %arg2[%c0_31, %57, %c0_32] : memref<1x256x4xf32, #tpu.memory_space<vmem>>, vector<1x1x4xf32>
    %59 = vector.shape_cast %58 : vector<1x1x4xf32> to vector<1x4xf32>
    %c8_i32_33 = arith.constant 8 : i32
    %60 = arith.muli %arg0, %c8_i32_33 : i32
    %c0_i32_34 = arith.constant 0 : i32
    %61 = arith.addi %60, %c0_i32_34 : i32
    %c6_i32 = arith.constant 6 : i32
    %62 = arith.addi %61, %c6_i32 : i32
    %63 = arith.index_cast %62 : i32 to index
    %64 = memref.load %arg1[%63] : memref<16xi32, #tpu.memory_space<smem>>
    %c0_i32_35 = arith.constant 0 : i32
    %c255_i32_36 = arith.constant 255 : i32
    %65 = arith.maxsi %c0_i32_35, %64 : i32
    %66 = arith.minsi %c255_i32_36, %65 : i32
    %c0_37 = arith.constant 0 : index
    %67 = arith.index_cast %66 : i32 to index
    %c0_38 = arith.constant 0 : index
    %68 = vector.load %arg2[%c0_37, %67, %c0_38] : memref<1x256x4xf32, #tpu.memory_space<vmem>>, vector<1x1x4xf32>
    %69 = vector.shape_cast %68 : vector<1x1x4xf32> to vector<1x4xf32>
    %c8_i32_39 = arith.constant 8 : i32
    %70 = arith.muli %arg0, %c8_i32_39 : i32
    %c0_i32_40 = arith.constant 0 : i32
    %71 = arith.addi %70, %c0_i32_40 : i32
    %c7_i32 = arith.constant 7 : i32
    %72 = arith.addi %71, %c7_i32 : i32
    %73 = arith.index_cast %72 : i32 to index
    %74 = memref.load %arg1[%73] : memref<16xi32, #tpu.memory_space<smem>>
    %c0_i32_41 = arith.constant 0 : i32
    %c255_i32_42 = arith.constant 255 : i32
    %75 = arith.maxsi %c0_i32_41, %74 : i32
    %76 = arith.minsi %c255_i32_42, %75 : i32
    %c0_43 = arith.constant 0 : index
    %77 = arith.index_cast %76 : i32 to index
    %c0_44 = arith.constant 0 : index
    %78 = vector.load %arg2[%c0_43, %77, %c0_44] : memref<1x256x4xf32, #tpu.memory_space<vmem>>, vector<1x1x4xf32>
    %79 = vector.shape_cast %78 : vector<1x1x4xf32> to vector<1x4xf32>
    %80 = tpu.concatenate %9, %19, %29, %39, %49, %59, %69, %79 in 0 : vector<1x4xf32>, vector<1x4xf32>, vector<1x4xf32>, vector<1x4xf32>, vector<1x4xf32>, vector<1x4xf32>, vector<1x4xf32>, vector<1x4xf32> -> vector<8x4xf32>
    %c0_45 = arith.constant 0 : index
    %c0_46 = arith.constant 0 : index
    %81 = vector.load %arg7[%c0_45, %c0_46] : memref<8x4xf32, #tpu.memory_space<vmem>>, vector<8x4xf32>
    tpu.vector_store %arg7[%c0_45, %c0_46], %80 {strides = array<i32>} : memref<8x4xf32, #tpu.memory_space<vmem>>, vector<8x4xf32>,
    %c0_47 = arith.constant 0 : index
    %c0_48 = arith.constant 0 : index
    %82 = vector.load %arg7[%c0_47, %c0_48] : memref<8x4xf32, #tpu.memory_space<vmem>>, vector<8x4xf32>
    %c0_49 = arith.constant 0 : index
    %c0_50 = arith.constant 0 : index
    %c0_51 = arith.constant 0 : index
    %83 = vector.load %arg3[%c0_49, %c0_50, %c0_51] : memref<1x8x4xf32, #tpu.memory_space<vmem>>, vector<1x8x4xf32>
    %84 = vector.shape_cast %83 : vector<1x8x4xf32> to vector<8x4xf32>
    %c0_52 = arith.constant 0 : index
    %c0_53 = arith.constant 0 : index
    %c0_54 = arith.constant 0 : index
    %85 = vector.load %arg4[%c0_52, %c0_53, %c0_54] : memref<1x8x1xf32, #tpu.memory_space<vmem>>, vector<1x8x1xf32>
    %86 = vector.shape_cast %85 : vector<1x8x1xf32> to vector<8x1xf32>
    %87 = arith.subf %82, %84 : vector<8x4xf32>
    %88 = math.absf %87 : vector<8x4xf32>
    %89 = vector.broadcast %86 : vector<8x1xf32> to vector<8x4xf32>
    %90 = arith.mulf %88, %89 : vector<8x4xf32>
    %cst = arith.constant dense<0.000000e+00> : vector<4xf32>
    %91 = vector.multi_reduction <add>, %90, %cst [0] : vector<8x4xf32> to vector<4xf32>
    %92 = vector.shape_cast %91 : vector<4xf32> to vector<1x4xf32>
    %c0_55 = arith.constant 0 : index
    %c0_56 = arith.constant 0 : index
    %c0_57 = arith.constant 0 : index
    %93 = vector.load %arg5[%c0_55, %c0_56, %c0_57] : memref<1x1x4xf32, #tpu.memory_space<vmem>>, vector<1x1x4xf32>
    %94 = vector.shape_cast %93 : vector<1x1x4xf32> to vector<1x4xf32>
    %95 = vector.shape_cast %92 : vector<1x4xf32> to vector<1x1x4xf32>
    tpu.vector_store %arg5[%c0_55, %c0_56, %c0_57], %95 {strides = array<i32>} : memref<1x1x4xf32, #tpu.memory_space<vmem>>, vector<1x1x4xf32>,
    %cst_58 = arith.constant dense<0.000000e+00> : vector<1xf32>
    %96 = vector.multi_reduction <add>, %86, %cst_58 [0] : vector<8x1xf32> to vector<1xf32>
    %97 = vector.shape_cast %96 : vector<1xf32> to vector<1x1xf32>
    %c0_59 = arith.constant 0 : index
    %c0_60 = arith.constant 0 : index
    %c0_61 = arith.constant 0 : index
    %98 = vector.load %arg6[%c0_59, %c0_60, %c0_61] : memref<1x1x1xf32, #tpu.memory_space<vmem>>, vector<1x1x1xf32>
    %99 = vector.shape_cast %98 : vector<1x1x1xf32> to vector<1x1xf32>
    %100 = vector.shape_cast %97 : vector<1x1xf32> to vector<1x1x1xf32>
    tpu.vector_store %arg6[%c0_59, %c0_60, %c0_61], %100 {strides = array<i32>} : memref<1x1x1xf32, #tpu.memory_space<vmem>>, vector<1x1x1xf32>,
    return
  }
  func.func @transform_0(%arg0: i32, %arg1: memref<16xi32, #tpu.memory_space<smem>>) -> (i32, i32, i32) {
    %c0_i32 = arith.constant 0 : i32
    %c0_i32_0 = arith.constant 0 : i32
    %c0_i32_1 = arith.constant 0 : i32
    return %arg0, %c0_i32, %c0_i32_0 : i32, i32, i32
  }
  func.func @transform_1(%arg0: i32, %arg1: memref<16xi32, #tpu.memory_space<smem>>) -> (i32, i32, i32) {
    %c0_i32 = arith.constant 0 : i32
    %c0_i32_0 = arith.constant 0 : i32
    %c0_i32_1 = arith.constant 0 : i32
    return %arg0, %c0_i32, %c0_i32_0 : i32, i32, i32
  }
  func.func @transform_2(%arg0: i32, %arg1: memref<16xi32, #tpu.memory_space<smem>>) -> (i32, i32, i32) {
    %c0_i32 = arith.constant 0 : i32
    %c0_i32_0 = arith.constant 0 : i32
    %c0_i32_1 = arith.constant 0 : i32
    return %arg0, %c0_i32, %c0_i32_0 : i32, i32, i32
  }
  func.func @transform_3(%arg0: i32, %arg1: memref<16xi32, #tpu.memory_space<smem>>) -> (i32, i32, i32) {
    %c0_i32 = arith.constant 0 : i32
    %c0_i32_0 = arith.constant 0 : i32
    %c0_i32_1 = arith.constant 0 : i32
    return %arg0, %c0_i32, %c0_i32_0 : i32, i32, i32
  }
  func.func @transform_4(%arg0: i32, %arg1: memref<16xi32, #tpu.memory_space<smem>>) -> (i32, i32, i32) {
    %c0_i32 = arith.constant 0 : i32
    %c0_i32_0 = arith.constant 0 : i32
    %c0_i32_1 = arith.constant 0 : i32
    return %arg0, %c0_i32, %c0_i32_0 : i32, i32, i32
  }
}

</mosaic_0001>

<bundles_post_ra>
// kernel: tpu_custom_call.1
= control target key start
LH: loop header
LB: loop body
LE: loop exit
PB: predicated region body
PF: predicated region fallthrough
CT: control target
= control target key end

     0   :  { %s868_s0 = inlined_call_operand.vmem [shape: s32[16], index: 0, kind: input, shape index: {}]   ;;  %s869_s1 = inlined_call_operand.vmem [shape: f32[2,256,4], index: 1, kind: input, shape index: {}]   ;;  %s870_s2 = inlined_call_operand.vmem [shape: f32[2,8,4], index: 2, kind: input, shape index: {}]   ;;  %s871_s3 = inlined_call_operand.vmem [shape: f32[2,8,1], index: 3, kind: input, shape index: {}]   ;;  %s872_s4 = inlined_call_operand.hbm [shape: f32[2,1,4], index: 4, kind: output, shape index: {0}]   ;;  %s873_s5 = inlined_call_operand.vmem [shape: f32[2,1,1], index: 5, kind: output, shape index: {1}]  }
   0x1   :  { %875 = sst [smem:[#allocation9_spill]] %s869_s1  ;;  %s11_s20 = sshll.u32 %s868_s0, 4  ;;  %s12_s20 = int_to_ptr.vmem [resolvable:$true] %s11_s20 }
   0x2   :  { %s612_s21 = scalar_lea.vmem %s12_s20, 16  ;;  %p617_p1 = scmp.lt.s32.totalorder %s12_s20, %s12_s20 }
   0x3   :  { %p613_p0 = scmp.ne.s32.totalorder %s12_s20, %s612_s21  ;;  %p618_p2 = scmp.lt.s32.totalorder %s612_s21, %s612_s21 }
   0x5   :  { %p619_p3 = por %p618_p2, %p617_p1 }
   0x7   :  { %p620_p4 = pnand %p619_p3, %p613_p0 }
   0x9   :  { %623 = shalt.err (!%p620_p4)  }
   0xa   :  { %s688_s22 = smov [#allocation4]  }
   0xb   :  { %14 = dma.vmem_to_smem %s12_s20, 16, %s688_s22, [#allocation3] }
   0xc   :  { %666 = dma.done.wait [#allocation3], 16 }
   0xd   :  { %667 = vsyncadd [#allocation3], 4294967280 }
   0xe   :  { %16 = sfence }
   0xf   :  { %17 = vsyncpa [#allocation6], 0 }
  0x10   :  { %19 = vsyncpa [#allocation6 + $0x1], 0  ;;  %s724_s23 = smov 0   ;;  %s726_s24 = smov 0  }
  0x11   :  { %s728_s0 = smov 0   ;;  %s730_s25 = smov 0  }
  0x12 LB: > { %s745_s26 = sadd.s32 4294967295, %s686_s25   ;;  %s501_s27 = sadd.s32 4294967294, %s686_s25   ;;  %s686_s25 = sphi %s730_s25, %s883_s25   ;;  %s682_s0 = sphi %s728_s0, %s882_s0   ;;  %s678_s24 = sphi %s726_s24, %s881_s24   ;;  %s674_s23 = sphi %s724_s23, %s880_s23  }
  0x13   : > { %s749_s28 = sadd.s32 1, %s686_s25   ;;  %s110_s29 = sadd.s32 1, %s682_s0 }
  0x14   : > { %s107_s30 = ssub.s32 %s686_s25, %s749_s28  ;;  %p120_p5 = scmp.ne.s32.totalorder %s682_s0, %s678_s24 }
  0x15   : > { %p108_p6 = scmp.eq.s32.totalorder %s107_s30, 0  ;;  %p121_p7 = scmp.eq.s32.totalorder %s745_s26, 1 }
  0x16   : > { %p126_p8 = scmp.ne.s32.totalorder %s678_s24, %s674_s23  ;;  %p127_p9 = scmp.eq.s32.totalorder %s501_s27, 1 }
  0x17   : > { %s760_s6 = scalar_select %p108_p6, %s682_s0, %s110_s29  }
  0x18   : > { %p762_p10 = por %p121_p7, %p120_p5  ;;  %p766_p11 = por %p127_p9, %p126_p8 }
  0x19   : > { %p504_p12 = scmp.ge.s32.totalorder %s686_s25, 1  ;;  %p193_p13 = scmp.lt.s32.totalorder %s686_s25, 3 }
  0x1b   : > { %p194_p0 = pnand %p504_p12, %p193_p13 }
  0x1c   : > { %p229_p1 = scmp.lt.s32.totalorder (!%p194_p0), %s745_s26, 1  ;;  %s774_s9 = sshll.u32 (!%p194_p0), %s745_s26, 3 }
  0x1d   : > { %197 = sbr.rel (%p194_p0) target bundleno = 191 (0xbf), region = 32  ;;  %s246_s10 = sld [smem:[#allocation4 + %s774_s9]] (!%p194_p0) }
  0x1e   : > { %s253_s11 = sadd.s32 (!%p194_p0), 1, %s774_s9  ;;  %s261_s15 = sadd.s32 (!%p194_p0), 2, %s774_s9 }
  0x1f   : > { %s254_s13 = sld [smem:[#allocation4 + %s253_s11]] (!%p194_p0)  ;;  %s269_s16 = sadd.s32 (!%p194_p0), 3, %s774_s9 }
  0x20   : > { %s878_s1 = sld [smem:[#allocation9_spill]] (!%p194_p0)  ;;  %s293_s21 = sadd.s32 (!%p194_p0), 6, %s774_s9 }
  0x21   : > { %s262_s11 = sld [smem:[#allocation4 + %s261_s15]] (!%p194_p0) }
  0x22   : > { %v689_v0 = vmov 0   ;;  %s779_s12 = scalar_select %p229_p1, %s745_s26, 1  ;;  %vm366_vm0 = vcmask 7168   ;;  %vm374_vm1 = vcmask 0   ;;  %vm330_vm2 = vcmask 1040384  }
  0x23   : > { %611 = vset.pattern.permute.xlu0 %v689_v0  ;;  %p247_p2 = scmp.gt.s32.totalorder %s246_s10, 0  ;;  %p510_p3 = scmp.lt.s32.totalorder %s246_s10, 255  ;;  %vm332_vm3 = vcmask 1041408   ;;  %vm334_vm4 = vcmask 1042432   ;;  %vm336_vm5 = vcmask 1043456   ;;  %vm338_vm6 = vcmask 1044480  }
  0x24   : > { %s874_s14 = sshll.u32 %s779_s12, 3  ;;  %s553_s19 = sshll.u32 %s779_s12, 8  ;;  %vm340_vm7 = vcmask 1045504   ;;  %vm342_vm8 = vcmask 1046528   ;;  %vm344_vm9 = vcmask 31744   ;;  %vm364_vm10 = vcmask 24576  }
  0x25   : > { %s241_s18 = scalar_lea.vmem %s871_s3, %s874_s14  ;;  %s244_s22 = scalar_lea.vmem %s873_s5, %s779_s12 }
  0x26   : > { %v348_v1 = vld [vmem:[%s241_s18] sm:$0xff]  ;;  %s796_s30 = scalar_lea.vmem %s878_s1, %s553_s19  ;;  %s885_s10 = smov (!%p247_p2, %s246_s10), 0 }
  0x27   : > { %353 = vperm.xlu0 %611, %v348_v1   ;;  %v367_v2 = vsel %vm366_vm0, %v348_v1, 0.0  ;;  %p255_p4 = scmp.gt.s32.totalorder %s254_s13, 0  ;;  %p515_p5 = scmp.lt.s32.totalorder %s254_s13, 255 }
  0x28   : > { %v368_v3 = vrot.slane %v367_v2, 4  ;;  %s887_s10 = smov (!%p510_p3, %s885_s10), 255  ;;  %s270_s17 = sld [smem:[#allocation4 + %s269_s16]] }
  0x29   : > { %s889_s13 = smov (!%p255_p4, %s254_s13), 0  ;;  %s277_s18 = sadd.s32 4, %s774_s9 }
  0x2a   : > { %v369_v4 = vadd.f32 %v368_v3, %v367_v2  ;;  %s891_s13 = smov (!%p515_p5, %s889_s13), 255  ;;  %p263_p6 = scmp.gt.s32.totalorder %s262_s11, 0 }
  0x2b   : > { %p520_p7 = scmp.lt.s32.totalorder %s262_s11, 255  ;;  %s278_s15 = sld [smem:[#allocation4 + %s277_s18]] }
  0x2c   : > { %v370_v5 = vrot.slane %v369_v4, 2  ;;  %s285_s19 = sadd.s32 5, %s774_s9  ;;  %s893_s11 = smov (!%p263_p6, %s262_s11), 0 }
  0x2d   : > { %s286_s20 = sld [smem:[#allocation4 + %s285_s19]]  ;;  %s895_s11 = smov (!%p520_p7, %s893_s11), 255 }
  0x2e   : > { %v371_v6 = vadd.f32 %v370_v5, %v369_v4  ;;  %p271_p8 = scmp.gt.s32.totalorder %s270_s17, 0  ;;  %p525_p9 = scmp.lt.s32.totalorder %s270_s17, 255 }
  0x2f   : > { %s294_s16 = sld [smem:[#allocation4 + %s293_s21]]  ;;  %s301_s14 = sadd.s32 7, %s774_s9 }
  0x30   : > { %v372_v7 = vrot.slane %v371_v6, 1  ;;  %s897_s17 = smov (!%p271_p8, %s270_s17), 0  ;;  %s812_s9 = sld [smem:[#allocation4 + %s301_s14]] }
  0x31   : > { %p279_p12 = scmp.gt.s32.totalorder %s278_s15, 0  ;;  %p530_p13 = scmp.lt.s32.totalorder %s278_s15, 255 }
  0x32   : > { %v373_v8 = vadd.f32 %v372_v7, %v371_v6  ;;  %s899_s17 = smov (!%p525_p9, %s897_s17), 255  ;;  %s259_s18 = scalar_lea.vmem %s796_s30, %s891_s13 }
  0x33   : > { %s901_s15 = smov (!%p279_p12, %s278_s15), 0  ;;  %p287_p0 = scmp.gt.s32.totalorder %s286_s20, 0  ;;  %v260_v10 = vld [vmem:[%s259_s18] sm:$0x1] }
  0x34   : > { %375 = vst.msk [vmem:[%s244_s22] sm:$0x1] %vm374_vm1, %v373_v8  ;;  %p535_p1 = scmp.lt.s32.totalorder %s286_s20, 255  ;;  %s903_s15 = smov (!%p530_p13, %s901_s15), 255  ;;  %v310_v14 = vrot.slane %v260_v10, 7 }
  0x35   : > { %s905_s20 = smov (!%p287_p0, %s286_s20), 0  ;;  %p295_p2 = scmp.gt.s32.totalorder %s294_s16, 0 }
  0x36   : > { %p540_p3 = scmp.lt.s32.totalorder %s294_s16, 255  ;;  %s907_s20 = smov (!%p535_p1, %s905_s20), 255 }
  0x37   : > { %s909_s16 = smov (!%p295_p2, %s294_s16), 0  ;;  %s251_s22 = scalar_lea.vmem %s796_s30, %s887_s10 }
  0x38   : > { %s911_s16 = smov (!%p540_p3, %s909_s16), 255  ;;  %s267_s19 = scalar_lea.vmem %s796_s30, %s895_s11  ;;  %v252_v9 = vld [vmem:[%s251_s22] sm:$0x1] }
  0x39   : > { %v268_v11 = vld [vmem:[%s267_s19] sm:$0x1]  ;;  %s275_s21 = scalar_lea.vmem %s796_s30, %s899_s17  ;;  %s283_s27 = scalar_lea.vmem %s796_s30, %s903_s15  ;;  %v331_v21 = vsel %vm330_vm2, %v252_v9, %v310_v14 }
  0x3a   : > { %v276_v12 = vld [vmem:[%s275_s21] sm:$0x1]  ;;  %s291_s29 = scalar_lea.vmem %s796_s30, %s907_s20  ;;  %s299_s1 = scalar_lea.vmem %s796_s30, %s911_s16  ;;  %v313_v15 = vrot.slane %v268_v11, 6 }
  0x3b   : > { %v284_v13 = vld [vmem:[%s283_s27] sm:$0x1]  ;;  %v316_v17 = vrot.slane %v276_v12, 5  ;;  %p303_p4 = scmp.gt.s32.totalorder %s812_s9, 0  ;;  %p545_p5 = scmp.lt.s32.totalorder %s812_s9, 255 }
  0x3c   : > { %v292_v16 = vld [vmem:[%s291_s29] sm:$0x1]  ;;  %v319_v18 = vrot.slane %v284_v13, 4  ;;  %v333_v22 = vsel %vm332_vm3, %v331_v21, %v313_v15  ;;  %s550_s17 = sshll.u32 %s745_s26, 4  ;;  %s690_s19 = smov [#allocation5]  }
  0x3d   : > { %v300_v19 = vld [vmem:[%s299_s1] sm:$0x1]  ;;  %v322_v20 = vrot.slane %v292_v16, 3  ;;  %s913_s9 = smov (!%p303_p4, %s812_s9), 0  ;;  %v335_v23 = vsel %vm334_vm4, %v333_v22, %v316_v17  ;;  %s879_s1 = sshll.u32 %s779_s12, 3 }
  0x3e   : > { %v325_v24 = vrot.slane %v300_v19, 2  ;;  %v337_v25 = vsel %vm336_vm5, %v335_v23, %v319_v18  ;;  %s915_s9 = smov (!%p545_p5, %s913_s9), 255  ;;  %s237_s11 = scalar_lea.vmem %s870_s2, %s879_s1 }
  0x3f   : > { %v339_v26 = vsel %vm338_vm6, %v337_v25, %v322_v20  ;;  %s307_s10 = scalar_lea.vmem %s796_s30, %s915_s9  ;;  %v347_v31 = vld [vmem:[%s237_s11] sm:$0xff]  ;;  %s222_s30 = sand.u32 1, %s678_s24  }
  0x40   : > { %v308_v27 = vld [vmem:[%s307_s10] sm:$0x1]  ;;  %v341_v28 = vsel %vm340_vm7, %v339_v26, %v325_v24  ;;  %s223_s15 = scalar_lea.vmem [#allocation5], %s222_s30  ;;  %s390_s9 = scalar_lea.hbm %s872_s4, %s550_s17 }
  0x41   : > { %v328_v29 = vrot.slane %v308_v27, 1  ;;  %s392_s12 = sshll.u32 %s223_s15, 4  ;;  %s377_s22 = scalar_lea.sflag [#allocation6], %s222_s30  ;;  %s393_s12 = int_to_ptr.vmem [resolvable:$true] %s392_s12 }
  0x42   : > { %s624_s18 = scalar_lea.vmem %s393_s12, 16  ;;  %s628_s21 = sshll.u32 %s690_s19, 4  ;;  %s629_s21 = int_to_ptr.vmem [resolvable:$false] %s628_s21 }
  0x43   : > { %v343_v30 = vsel %vm342_vm8, %v341_v28, %v328_v29  ;;  %p625_p6 = scmp.ne.s32.totalorder %s393_s12, %s624_s18  ;;  %s630_s26 = scalar_lea.vmem %s629_s21, 32 }
  0x44   : > { %345 = vst.msk [vmem:[#allocation2] sm:$0xff] %vm344_vm9, %v343_v30  ;;  %p631_p9 = scmp.lt.s32.totalorder %s393_s12, %s629_s21  ;;  %p632_p12 = scmp.lt.s32.totalorder %s630_s26, %s624_s18 }
  0x45   : > { %p626_p7 = pnand %p625_p6, %p762_p10 }
  0x46   : > { %p633_p13 = por %p632_p12, %p631_p9 }
  0x47   : > { %p627_p8 = pneg %p626_p7 }
  0x49   : > { %p634_p0 = pnand %p633_p13, %p627_p8 }
  0x4b   : > { %v346_v32 = vld [vmem:[#allocation2] sm:$0xff] }
  0x4c   : > { %v349_v33 = vsub.f32 %v346_v32, %v347_v31 }
  0x4e   : > { %v350_v34 = vand.u32 2147483647, %v349_v33 }
  0xa2   : > { %v354_v35 = vpop.permute.xlu0 %353 }
  0xa3   : > { %v356_v36 = vmul.f32 %v354_v35, %v350_v34 }
  0xa5   : > { %v357_v37 = vsel %vm344_vm9, %v356_v36, 0.0 }
  0xa6   : > { %v358_v38 = vrot.slane %v357_v37, 4 }
  0xa8   : > { %v359_v39 = vadd.f32 %v358_v38, %v357_v37 }
  0xaa   : > { %v360_v40 = vrot.slane %v359_v39, 2 }
  0xac   : > { %v361_v41 = vadd.f32 %v360_v40, %v359_v39 }
  0xae   : > { %v362_v42 = vrot.slane %v361_v41, 1 }
  0xb0   : > { %v363_v43 = vadd.f32 %v362_v42, %v361_v41 }
  0xb2   : > { %365 = vst.msk [vmem:[%s223_s15] sm:$0x1] %vm364_vm10, %v363_v43 }
  0xb3   : > { %637 = shalt.err (!%p634_p0)
}
  0xb4   : > { %s638_s27 = scalar_lea.hbm %s390_s9, 16  ;;  %s642_s1 = scalar_lea.hbm %s872_s4, 32 }
  0xb5   : > { %p639_p1 = scmp.ne.s32.totalorder %s390_s9, %s638_s27  ;;  %p643_p4 = scmp.lt.s32.totalorder %s390_s9, %s872_s4 }
  0xb6   : > { %p644_p5 = scmp.lt.s32.totalorder %s642_s1, %s638_s27 }
  0xb7   : > { %p640_p2 = pnand %p639_p1, %p762_p10 }
  0xb8   : > { %p645_p6 = por %p644_p5, %p643_p4 }
  0xb9   : > { %p641_p3 = pneg %p640_p2 }
  0xbb   : > { %p646_p7 = pnand %p645_p6, %p641_p3 }
  0xbd   : > { %649 = shalt.err (!%p646_p7)
}
  0xbe   : > { %570 = dma.vmem_to_hbm [thread:$0]  (%p762_p10), %s393_s12, 16, %s390_s9, %s377_s22  }
  0xbf PF: > { %p576_p8 = scmp.ge.s32.totalorder %s686_s25, 2  ;;  %s407_s11 = sand.u32 1, %s674_s23  }
  0xc0   : > { %s408_s30 = scalar_lea.sflag [#allocation6], %s407_s11 }
  0xc1   : > { %p573_p9 = pnand %p576_p8, %p766_p11 }
  0xc3   : > { %p574_p12 = pneg %p573_p9 }
  0xc5   : > { %669 = dma.done.wait (%p574_p12), %s408_s30, 16  }
  0xc6   : > { %671 = vsyncadd (%p574_p12), %s408_s30, 4294967280  ;;  %p22_p13 = scmp.ge.s32.totalorder %s749_s28, 4   ;;  %s880_s23 = smov %s678_s24 }
  0xc7   : > { %s881_s24 = smov %s682_s0  ;;  %s882_s0 = smov %s760_s6 }
  0xc8   : > { %s883_s25 = smov %s749_s28  ;;  %24 = sbr.rel (!%p22_p13) target bundleno = 18 (0x12), region = 93 }
  0xcd   :  { %418 = vsyncpa [#allocation6], 1 }
  0xce   :  { %420 = vsyncpa [#allocation6 + $0x1], 1 }

</bundles_post_ra>
